<compile_context>
chip_gen: v7x
topology: tpu7x:2x2x1
jax: 0.10.0
libtpu: 0.0.40
codegen_flags: <defaults>
</compile_context>

<pallas_src>
import functools

import jax
import jax.numpy as jnp
from jax.experimental import pallas as pl
from jax.experimental.pallas import tpu as pltpu


def _supcon_kernel(proj_ref, tgt_ref, out_ref, *, inv_temperature):
    # proj_ref: (B, D) f32   tgt_ref: (B, 1) i32   out_ref: (1, 1) f32
    p = proj_ref[...].astype(jnp.float32)                       # (B, D)
    B = p.shape[0]

    # Gram matrix on the MXU; contraction on the last dim of both operands
    # avoids materializing p.T.  Scale by 1/T with a VALU multiply.
    dot = jax.lax.dot_general(
        p, p,
        dimension_numbers=(((1,), (1,)), ((), ())),
        preferred_element_type=jnp.float32,
    ) * inv_temperature                                          # (B, B)

    # Numerically stable exp, keeping the reference's +1e-5 term.
    row_max = jnp.max(dot, axis=1, keepdims=True)                # (B, 1)
    exp_dot = jnp.exp(dot - row_max) + 1e-5                      # (B, B)

    # Class-equality mask from the single (B,1) target column.  A rank-1 MXU
    # matmul replicates t along lanes (t[j] at every row (i,j)) so we need
    # neither a second target DMA nor an in-kernel transpose.
    t_col = tgt_ref[...].astype(jnp.float32)                     # (B, 1) = t[i]
    t_row = jax.lax.dot_general(
        jnp.ones_like(t_col), t_col,
        dimension_numbers=(((1,), (1,)), ((), ())),
        preferred_element_type=jnp.float32,
    )                                                            # (B, B) = t[j]
    # Exact for integer class ids: distinct ids differ by >= 1.
    same_class = jnp.abs(t_col - t_row) < 0.5                    # (B, B) bool

    rid = jax.lax.broadcasted_iota(jnp.int32, (B, B), 0)
    cid = jax.lax.broadcasted_iota(jnp.int32, (B, B), 1)
    not_diag = rid != cid                                        # (B, B) bool
    mask_combined = (same_class & not_diag).astype(jnp.float32)  # (B, B)

    cardinality = jnp.sum(mask_combined, axis=1, keepdims=True)  # (B, 1)

    # Denominator: masked row-sum of exp_dot (diagonal dropped via select).
    denom = jnp.sum(jnp.where(not_diag, exp_dot, 0.0),
                    axis=1, keepdims=True)                       # (B, 1)

    # sum_j mask*(-log(exp_dot/denom))/card = log(denom) - sum_j mask*log(exp_dot)/card
    # Exact rewrite of the reference; keeps +1e-5 inside log(exp_dot).
    log_exp = jnp.log(exp_dot)                                   # (B, B)
    num = jnp.sum(mask_combined * log_exp, axis=1, keepdims=True)  # (B, 1)

    # No cardinality guard: anchors with no positives give 0/0 -> NaN, the
    # same behaviour as the PyTorch reference.
    per_sample = jnp.log(denom) - num / cardinality              # (B, 1)

    out_ref[...] = jnp.mean(per_sample).reshape(1, 1)


def supervised_contrastive_loss(projections, targets, temperature=0.07):
    """projections: (B, D) float32, targets: (B,) int -> scalar float32."""
    B, D = projections.shape
    tgt_col = targets.astype(jnp.int32).reshape(B, 1)

    kernel = functools.partial(_supcon_kernel,
                               inv_temperature=float(1.0 / temperature))

    out = pl.pallas_call(
        kernel,
        out_shape=jax.ShapeDtypeStruct((1, 1), jnp.float32),
        in_specs=[
            pl.BlockSpec(memory_space=pltpu.MemorySpace.VMEM),
            pl.BlockSpec(memory_space=pltpu.MemorySpace.VMEM),
        ],
        out_specs=pl.BlockSpec(memory_space=pltpu.MemorySpace.VMEM),
    )(projections.astype(jnp.float32), tgt_col)
    return out[0, 0]


def _reference_loss(projections, targets, temperature=0.07):
    # Pure-JAX mirror of the PyTorch module (original formulation, with the
    # explicit divide and -log), used to validate the algebraic rewrite.
    dot = (projections @ projections.T) / temperature
    exp_dot = jnp.exp(dot - jnp.max(dot, axis=1, keepdims=True)) + 1e-5
    mask_similar = (targets[:, None] == targets[None, :]).astype(jnp.float32)
    mask_anchor_out = 1.0 - jnp.eye(projections.shape[0], dtype=jnp.float32)
    mask_combined = mask_similar * mask_anchor_out
    card = jnp.sum(mask_combined, axis=1)
    log_prob = -jnp.log(exp_dot / jnp.sum(exp_dot * mask_anchor_out,
                                          axis=1, keepdims=True))
    per_sample = jnp.sum(log_prob * mask_combined, axis=1) / card
    return jnp.mean(per_sample)


if __name__ == "__main__":
    key = jax.random.PRNGKey(0)
    (k1,) = jax.random.split(key, 1)

    B, D = 8, 32
    projections = jax.random.normal(k1, (B, D), dtype=jnp.float32)
    # Fixed 2-class pattern so every anchor has positives (cardinality > 0).
    targets = jnp.array([0, 1, 0, 1, 0, 1, 0, 1], dtype=jnp.int32)

    loss = supervised_contrastive_loss(projections, targets, temperature=0.07)
    loss = jax.block_until_ready(loss)

    ref = _reference_loss(projections, targets, temperature=0.07)
    assert jnp.isfinite(loss), "kernel produced non-finite loss"
    assert jnp.allclose(loss, ref, rtol=1e-4, atol=1e-4), (loss, ref)

    print("KERNEL_OK")
</pallas_src>

<mosaic_0001>
module attributes {stable_mosaic.version = 11 : i64} {
  func.func @_supcon_kernel(%arg0: memref<8x32xf32, #tpu.memory_space<vmem>>, %arg1: memref<8x1xi32, #tpu.memory_space<vmem>>, %arg2: memref<1x1xf32, #tpu.memory_space<vmem>>) attributes {dimension_semantics = [], scalar_prefetch = 0 : i64, scratch_operands = 0 : i64, tpu.core_type = #tpu.core_type<tc>} {
    %c0 = arith.constant 0 : index
    %c0_0 = arith.constant 0 : index
    %0 = vector.load %arg0[%c0, %c0_0] : memref<8x32xf32, #tpu.memory_space<vmem>>, vector<8x32xf32>
    %cst = arith.constant dense<0.000000e+00> : vector<8x8xf32>
    %1 = tpu.matmul %0, %0, %cst {dimension_numbers = #tpu.dot_dimension_numbers<[1], [1], [0], [0], [0, 0, 1, 0], [], []>} : vector<8x32xf32>, vector<8x32xf32>, vector<8x8xf32> -> vector<8x8xf32>
    %cst_1 = arith.constant 14.2857141 : f32
    %2 = vector.broadcast %cst_1 : f32 to vector<8x8xf32>
    %3 = arith.mulf %1, %2 : vector<8x8xf32>
    %cst_2 = arith.constant dense<0xFF800000> : vector<8xf32>
    %4 = vector.multi_reduction <maximumf>, %3, %cst_2 [1] : vector<8x8xf32> to vector<8xf32>
    %5 = vector.shape_cast %4 : vector<8xf32> to vector<8x1xf32>
    %6 = vector.broadcast %5 : vector<8x1xf32> to vector<8x8xf32>
    %7 = arith.subf %3, %6 : vector<8x8xf32>
    %8 = math.exp %7 : vector<8x8xf32>
    %cst_3 = arith.constant 9.99999974E-6 : f32
    %9 = vector.broadcast %cst_3 : f32 to vector<8x8xf32>
    %10 = arith.addf %8, %9 : vector<8x8xf32>
    %c0_4 = arith.constant 0 : index
    %c0_5 = arith.constant 0 : index
    %11 = vector.load %arg1[%c0_4, %c0_5] : memref<8x1xi32, #tpu.memory_space<vmem>>, vector<8x1xi32>
    %12 = arith.sitofp %11 : vector<8x1xi32> to vector<8x1xf32>
    %cst_6 = arith.constant 1.000000e+00 : f32
    %13 = vector.broadcast %cst_6 : f32 to vector<8x1xf32>
    %cst_7 = arith.constant dense<0.000000e+00> : vector<8x8xf32>
    %14 = tpu.matmul %13, %12, %cst_7 {dimension_numbers = #tpu.dot_dimension_numbers<[1], [1], [0], [0], [0, 0, 1, 0], [], []>} : vector<8x1xf32>, vector<8x1xf32>, vector<8x8xf32> -> vector<8x8xf32>
    %15 = vector.broadcast %12 : vector<8x1xf32> to vector<8x8xf32>
    %16 = arith.subf %15, %14 : vector<8x8xf32>
    %17 = math.absf %16 : vector<8x8xf32>
    %cst_8 = arith.constant 5.000000e-01 : f32
    %18 = vector.broadcast %cst_8 : f32 to vector<8x8xf32>
    %19 = arith.cmpf olt, %17, %18 : vector<8x8xf32>
    %20 = tpu.iota {dimensions = array<i32: 0>} : vector<8x8xi32>
    %21 = tpu.iota {dimensions = array<i32: 1>} : vector<8x8xi32>
    %22 = arith.cmpi ne, %20, %21 : vector<8x8xi32>
    %23 = arith.andi %19, %22 : vector<8x8xi1>
    %24 = arith.extui %23 : vector<8x8xi1> to vector<8x8xi32>
    %25 = arith.sitofp %24 : vector<8x8xi32> to vector<8x8xf32>
    %cst_9 = arith.constant dense<0.000000e+00> : vector<8xf32>
    %26 = vector.multi_reduction <add>, %25, %cst_9 [1] : vector<8x8xf32> to vector<8xf32>
    %27 = vector.shape_cast %26 : vector<8xf32> to vector<8x1xf32>
    %cst_10 = arith.constant 0.000000e+00 : f32
    %28 = vector.broadcast %cst_10 : f32 to vector<8x8xf32>
    %29 = arith.select %22, %10, %28 : vector<8x8xi1>, vector<8x8xf32>
    %cst_11 = arith.constant dense<0.000000e+00> : vector<8xf32>
    %30 = vector.multi_reduction <add>, %29, %cst_11 [1] : vector<8x8xf32> to vector<8xf32>
    %31 = vector.shape_cast %30 : vector<8xf32> to vector<8x1xf32>
    %32 = math.log %10 : vector<8x8xf32>
    %33 = arith.mulf %25, %32 : vector<8x8xf32>
    %cst_12 = arith.constant dense<0.000000e+00> : vector<8xf32>
    %34 = vector.multi_reduction <add>, %33, %cst_12 [1] : vector<8x8xf32> to vector<8xf32>
    %35 = vector.shape_cast %34 : vector<8xf32> to vector<8x1xf32>
    %36 = math.log %31 : vector<8x1xf32>
    %37 = arith.divf %35, %27 : vector<8x1xf32>
    %38 = arith.subf %36, %37 : vector<8x1xf32>
    %39 = vector.shape_cast %38 : vector<8x1xf32> to vector<1x8x1xf32>
    %cst_13 = arith.constant dense<0.000000e+00> : vector<1xf32>
    %40 = vector.multi_reduction <add>, %39, %cst_13 [1, 2] : vector<1x8x1xf32> to vector<1xf32>
    %41 = vector.shape_cast %40 : vector<1xf32> to vector<1x1x1xf32>
    %42 = vector.extract %41[0, 0, 0] : f32 from vector<1x1x1xf32>
    %cst_14 = arith.constant 8.000000e+00 : f32
    %43 = arith.divf %42, %cst_14 : f32
    %44 = vector.broadcast %43 : f32 to vector<1x1xf32>
    %c0_15 = arith.constant 0 : index
    %c0_16 = arith.constant 0 : index
    %45 = vector.load %arg2[%c0_15, %c0_16] : memref<1x1xf32, #tpu.memory_space<vmem>>, vector<1x1xf32>
    tpu.vector_store %arg2[%c0_15, %c0_16], %44 {strides = array<i32>} : memref<1x1xf32, #tpu.memory_space<vmem>>, vector<1x1xf32>,
    return
  }
}

</mosaic_0001>

<bundles_post_ra>
// kernel: tpu_custom_call.1
= control target key start
LH: loop header
LB: loop body
LE: loop exit
PB: predicated region body
PF: predicated region fallthrough
CT: control target
= control target key end

     0   :  { %vm13_vm0 = vcmask 261120   ;;  %vm98_vm1 = vcmask 7168   ;;  %v297_v2 = vmov 0.0   ;;  %vm298_vm2 = vmmov 0   ;;  %s342_s0 = inlined_call_operand.vmem [shape: f32[8,32], index: 0, kind: input, shape index: {}]   ;;  %s343_s1 = inlined_call_operand.vmem [shape: s32[8,1], index: 1, kind: input, shape index: {}]   ;;  %s344_s2 = inlined_call_operand.hbm [shape: f32[1,1], index: 2, kind: output, shape index: {}]  }
   0x1   :  { %v12_v0 = vld [vmem:[%s342_s0] sm:$0xff]  ;;  %247 = vmatprep.subr.mxu0 %v297_v2  ;;  %249 = vmatprep.mubr.msk.f32.mxu0 %vm298_vm2, %v297_v2 }
   0x2   :  { %v96_v1 = vld [vmem:[%s343_s1] sm:$0xff] }
   0x3   :  { %v97_v3 = vcvt.s32.f32 %v96_v1 }
   0x4   :  { %7 = vsyncpa [#allocation3], 0  ;;  %248 = vmatpush3.xpose.msk.msra.mxu0 %vm13_vm0, %v12_v0  ;;  %252 = vmatprep.subr.mxu1 %v297_v2  ;;  %v299_v4 = vmov 1.0   ;;  %v300_v5 = vmov 0   ;;  %vm88_vm3 = vcmask 64512   ;;  %v182_v15 = vlaneseq  ;;  %s301_s0 = smov [#allocation2]  }
   0x5   :  { %253 = vmatpush3.xpose.msk.msra.mxu1 %vm98_vm1, %v97_v3  ;;  %254 = vmatprep.mubr.msk.f32.mxu1 %vm298_vm2, %v297_v2  ;;  %s230_s1 = sshll.u32 %s301_s0, 4  ;;  %vm222_vm7 = vcmask 0   ;;  %s231_s1 = int_to_ptr.vmem [resolvable:$true] %s230_s1 }
   0x6   :  { %264 = vset.pattern.permute.xlu0 %v300_v5  ;;  %v183_v16 = vshrl.u32 %v182_v15, 7  ;;  %v185_v17 = vand.u32 127, %v182_v15  ;;  %s273_s15 = scalar_lea.vmem %s231_s1, 16  ;;  %s277_s16 = scalar_lea.vmem %s231_s1, 32 }
   0x7   :  { %250 = vmatmul.mubr.msk.f32.vlgmr.msra.gmra.mrb[0].mxu0 %vm13_vm0, %v12_v0  ;;  %p274_p0 = scmp.ne.s32.totalorder %s231_s1, %s273_s15  ;;  %p278_p1 = scmp.lt.s32.totalorder %s231_s1, %s231_s1 }
   0x8   :  { %255 = vmatmul.mubr.msk.f32.vlgmr.msra.gmra.mrb[0].mxu1 %vm98_vm1, %v299_v4  ;;  %vm186_vm4 = vcmp.ne.s32.totalorder %v183_v16, %v185_v17  ;;  %p279_p2 = scmp.lt.s32.totalorder %s277_s16, %s273_s15 }
   0xa   :  { %p280_p3 = por %p279_p2, %p278_p1 }
   0xc   :  { %p281_p4 = pnand %p280_p3, %p274_p0 }
  0xda   :  { %v83_v6 = vpop.f32.mrb[0].mxu0 }
  0xdb   :  { %v87_v7 = vmul.f32 14.285714, %v83_v6  ;;  %v251_v8 = vpop.f32.mrb[1].mxu0  ;;  %v171_v10 = vpop.f32.mrb[0].mxu1 }
  0xdc   :  { %v256_v11 = vpop.f32.mrb[1].mxu1 }
  0xdd   :  { %v89_v9 = vsel %vm88_vm3, %v87_v7, -inf }
  0xde   :  { %90 = vmax.xlane.f32.xlu0 %v89_v9 }
  0xf4   :  { %176 = vperm.xlu0 %264, %v97_v3  }
 0x16b   :  { %v91_v12 = vpop.xlane.xlu0 %90 }
 0x16c   :  { %v92_v13 = vsub.f32 %v87_v7, %v91_v12 }
 0x16e   :  { %v93_v14 = vmul.f32 1.442695, %v92_v13 }
 0x170   :  { %265 = vpow2.f32 %v93_v14 }
 0x173   :  { %v177_v18 = vpop.permute.xlu0 %176 }
 0x174   :  { %v179_v19 = vsub.f32 %v177_v18, %v171_v10 }
 0x176   :  { %v180_v20 = vand.u32 2147483647, %v179_v19 }
 0x178   :  { %vm181_vm5 = vcmp.lt.f32.partialorder %v180_v20, 0.5 }
 0x179   :  { %vm187_vm6 = vmand %vm181_vm5, %vm186_vm4 }
 0x17a   :  { %v266_v21 = vpop.eup %265  ;;  %v242_v22 = vsel %vm187_vm6, 1.0, %v297_v2 }
 0x17b   :  { %v95_v23 = vadd.f32 1e-05, %v266_v21  ;;  %v190_v24 = vsel %vm88_vm3, %v242_v22, 0.0 }
 0x17c   :  { %191 = vadd.xlane.f32.xlu1 %v190_v24 }
 0x17d   :  { %267 = vlog2.f32 %v95_v23  ;;  %v193_v25 = vsel %vm186_vm4, %v95_v23, 0.0 }
 0x17e   :  { %v194_v26 = vsel %vm88_vm3, %v193_v25, 0.0 }
 0x180   :  { %195 = vadd.xlane.f32.xlu1 %v194_v26 }
 0x187   :  { %v268_v27 = vpop.eup %267 }
 0x188   :  { %v198_v28 = vmul.f32 0.6931472, %v268_v27 }
 0x18a   :  { %v199_v29 = vmul.f32 %v242_v22, %v198_v28 }
 0x18c   :  { %v200_v30 = vsel %vm88_vm3, %v199_v29, 0.0 }
 0x18d   :  { %201 = vadd.xlane.f32.xlu1 %v200_v30 }
 0x209   :  { %v192_v31 = vpop.xlane.xlu1 %191 }
 0x20d   :  { %v196_v32 = vpop.xlane.xlu1 %195 }
 0x20e   :  { %269 = vlog2.f32 %v196_v32 }
 0x20f   :  { %271 = vrcp.f32 %v192_v31 }
 0x218   :  { %v270_v33 = vpop.eup %269 }
 0x219   :  { %v272_v34 = vpop.eup %271  ;;  %v204_v36 = vmul.f32 0.6931472, %v270_v33 }
 0x21a   :  { %v202_v35 = vpop.xlane.xlu1 %201 }
 0x21b   :  { %v206_v37 = vmul.f32 %v272_v34, %v202_v35 }
 0x21d   :  { %v207_v38 = vsub.f32 %v204_v36, %v206_v37 }
 0x21f   :  { %v208_v39 = vsel %vm98_vm1, %v207_v38, 0.0 }
 0x220   :  { %209 = vadd.xlane.f32.xlu1 %v208_v39 }
 0x2ad   :  { %v210_v40 = vpop.xlane.xlu1 %209 }
 0x2ae   :  { %v211_v41 = vrot.slane %v210_v40, 4 }
 0x2b0   :  { %v212_v42 = vadd.f32 %v211_v41, %v210_v40 }
 0x2b2   :  { %v213_v43 = vrot.slane %v212_v42, 2 }
 0x2b4   :  { %v214_v44 = vadd.f32 %v213_v43, %v212_v42 }
 0x2b6   :  { %v215_v45 = vrot.slane %v214_v44, 1 }
 0x2b8   :  { %v216_v46 = vadd.f32 %v215_v45, %v214_v44 }
 0x2ba   :  { %257 = vpush %v216_v46 }
 0x2eb   :  { %s258_s13 = spop %257 }
 0x2ec   :  { %s220_s14 = smul.f32 0.125, %s258_s13 }
 0x2ee   :  { %v221_v47 = vstv %s220_s14 }
 0x2ef   :  { %223 = vst.msk [vmem:[#allocation2] sm:$0x1] %vm222_vm7, %v221_v47 }
 0x2f0   :  { %284 = shalt.err (!%p281_p4)
}
 0x2f1   :  { %s285_s19 = scalar_lea.hbm %s344_s2, 16 }
 0x2f2   :  { %p286_p5 = scmp.ne.s32.totalorder %s344_s2, %s285_s19  ;;  %p289_p6 = scmp.lt.u32.totalorder %s285_s19, %s344_s2 }
 0x2f4   :  { %p291_p7 = pnand %p289_p6, %p286_p5 }
 0x2f6   :  { %294 = shalt.err (!%p291_p7)
}
 0x2f7   :  { %233 = dma.vmem_to_hbm [thread:$0]  %s231_s1, 16, %s344_s2, [#allocation3]  }
 0x2f8   :  { %295 = dma.done.wait [#allocation3], 16  }
 0x2f9   :  { %296 = vsyncadd [#allocation3], 4294967280 }
 0x2fa   :  { %237 = vsyncpa [#allocation3], 1 }

</bundles_post_ra>
